<compile_context>
chip_gen: v7x
topology: tpu7x:2x2x1
jax: 0.10.0
libtpu: 0.0.40
codegen_flags: <defaults>
</compile_context>

<pallas_src>
import jax
import jax.numpy as jnp
from jax.experimental import pallas as pl
from jax.experimental.pallas import tpu as pltpu

_LANE = 128     # vreg lane width
_SUBLANE = 8    # f32 sublane count


def _round_up(x, m):
    return (x + m - 1) // m * m


def _qnet_kernel(x_ref, w1_ref, b1_ref, w2_ref, b2_ref, out_ref):
    # Two MXU matmuls + VPU bias-add / ReLU on VMEM-resident tiles.
    x = x_ref[...]                                              # (tb, I)
    h = jnp.dot(x, w1_ref[...],
                preferred_element_type=jnp.float32)             # (tb, Hp)
    h = jnp.maximum(h + b1_ref[...], 0.0)                       # bias + ReLU
    y = jnp.dot(h, w2_ref[...],
                preferred_element_type=jnp.float32)             # (tb, O)
    out_ref[...] = (y + b2_ref[...]).astype(out_ref.dtype)


def prepare_qnetwork_params(w1, b1, w2, b2):
    """Pad the hidden dim to the 128-lane width. Call ONCE at init / after each
    parameter update -- NOT per forward call.

    w1: (I, H), b1: (H,) or (1, H), w2: (H, O), b2: (O,) or (1, O)
    Returns (w1p, b1p, w2p, b2p) with H padded to a multiple of 128.
    Padded columns of w1/b1 give h == relu(0) == 0, and the matching padded rows
    of w2 are zero, so the result is exact.
    """
    hidden = w1.shape[1]
    hp = _round_up(hidden, _LANE)
    w1p = jnp.pad(w1, ((0, 0), (0, hp - hidden)))
    b1p = jnp.pad(b1.reshape(1, -1), ((0, 0), (0, hp - hidden)))
    w2p = jnp.pad(w2, ((0, hp - hidden), (0, 0)))
    b2p = b2.reshape(1, -1)
    return w1p, b1p, w2p, b2p


def _pick_block_batch(batch, *, num_tensorcores=1, max_block=2048):
    """One tile per TensorCore when possible (grid == num_tensorcores); stream
    max_block-row tiles for very large batches."""
    tb = pl.cdiv(batch, num_tensorcores)
    tb = min(tb, max_block)
    return _round_up(max(tb, _SUBLANE), _SUBLANE)


def qnetwork_forward(state, w1p, b1p, w2p, b2p, *, block_batch=None,
                     num_tensorcores=1):
    """Forward pass of QNetwork with pre-padded params (see prepare_qnetwork_params).

    state: (B, I) f32
    w1p: (I, Hp) f32, b1p: (1, Hp) f32    (fc1, hidden padded to 128 lanes)
    w2p: (Hp, O) f32, b2p: (1, O)  f32    (fc2)
    Returns (B, O) f32.
    """
    batch, in_size = state.shape
    hp = w1p.shape[1]
    out_size = w2p.shape[1]

    if block_batch is None:
        block_batch = _pick_block_batch(batch, num_tensorcores=num_tensorcores)
    tb = min(block_batch, _round_up(batch, _SUBLANE))
    tb = _round_up(tb, _SUBLANE)
    grid = (pl.cdiv(batch, tb),)   # ragged last block is masked by Pallas

    itemsize = 4  # f32
    flops = 2 * batch * (in_size * hp + hp * out_size)
    bytes_accessed = itemsize * (
        batch * in_size + w1p.size + b1p.size + w2p.size + b2p.size
        + batch * out_size)

    return pl.pallas_call(
        _qnet_kernel,
        out_shape=jax.ShapeDtypeStruct((batch, out_size), jnp.float32),
        grid_spec=pltpu.PrefetchScalarGridSpec(
            num_scalar_prefetch=0,
            grid=grid,
            in_specs=[
                # x tile streams over the batch grid (full last dim == I).
                pl.BlockSpec((tb, in_size), lambda i: (i, 0)),
                # weights / biases stay VMEM-resident across iterations.
                pl.BlockSpec((in_size, hp), lambda i: (0, 0)),
                pl.BlockSpec((1, hp), lambda i: (0, 0)),
                pl.BlockSpec((hp, out_size), lambda i: (0, 0)),
                pl.BlockSpec((1, out_size), lambda i: (0, 0)),
            ],
            # Un-padded output block: full last dim (O) is legal; avoids 64x
            # writeback inflation for small action spaces.
            out_specs=pl.BlockSpec((tb, out_size), lambda i: (i, 0)),
        ),
        compiler_params=pltpu.CompilerParams(
            # Batch axis is fully independent -> shard across TCs on v7x.
            dimension_semantics=("parallel",),
            # Tiles are KB-scale even at tb=2048; 32 MiB is a safe budget on
            # v5e/v6e (128 MiB physical) and v7x (64 MiB physical).
            vmem_limit_bytes=32 * 1024 * 1024,
        ),
        cost_estimate=pl.CostEstimate(
            flops=flops, transcendentals=0, bytes_accessed=bytes_accessed),
    )(state, w1p, b1p, w2p, b2p)


def init_qnetwork_params(key, input_size, hidden_size, output_size):
    """PyTorch nn.Linear default init: U(-1/sqrt(fan_in), 1/sqrt(fan_in))."""
    k1, k2, k3, k4 = jax.random.split(key, 4)
    bound1 = 1.0 / jnp.sqrt(jnp.float32(input_size))
    bound2 = 1.0 / jnp.sqrt(jnp.float32(hidden_size))
    # stored as (in, out) == transpose of PyTorch's (out, in)
    w1 = jax.random.uniform(k1, (input_size, hidden_size), jnp.float32,
                            minval=-bound1, maxval=bound1)
    b1 = jax.random.uniform(k2, (1, hidden_size), jnp.float32,
                            minval=-bound1, maxval=bound1)
    w2 = jax.random.uniform(k3, (hidden_size, output_size), jnp.float32,
                            minval=-bound2, maxval=bound2)
    b2 = jax.random.uniform(k4, (1, output_size), jnp.float32,
                            minval=-bound2, maxval=bound2)
    return w1, b1, w2, b2


if __name__ == "__main__":
    key = jax.random.PRNGKey(0)
    k_params, k_state = jax.random.split(key)

    batch = 8
    input_size = 4      # e.g. CartPole observation dim
    hidden_size = 32
    output_size = 2     # number of discrete actions

    w1, b1, w2, b2 = init_qnetwork_params(k_params, input_size,
                                          hidden_size, output_size)
    # Padding is done once here (and would be redone only after param updates).
    w1p, b1p, w2p, b2p = prepare_qnetwork_params(w1, b1, w2, b2)
    jax.block_until_ready((w1p, b1p, w2p, b2p))

    state = jax.random.normal(k_state, (batch, input_size), jnp.float32)

    # Small inference-style batch: single grid step, un-padded output.
    out = qnetwork_forward(state, w1p, b1p, w2p, b2p)
    jax.block_until_ready(out)
    ref = jnp.maximum(state @ w1 + b1, 0.0) @ w2 + b2
    assert out.shape == (batch, output_size)
    assert jnp.allclose(out, ref, atol=1e-5, rtol=1e-5)

    # Training-sized batch with a forced small tile: exercises the multi-step
    # ragged batch grid (1000 rows, tb=256 -> 4 steps, last block masked).
    big_state = jax.random.normal(jax.random.PRNGKey(1), (1000, input_size),
                                  jnp.float32)
    big_out = qnetwork_forward(big_state, w1p, b1p, w2p, b2p, block_batch=256)
    jax.block_until_ready(big_out)
    big_ref = jnp.maximum(big_state @ w1 + b1, 0.0) @ w2 + b2
    assert big_out.shape == (1000, output_size)
    assert jnp.allclose(big_out, big_ref, atol=1e-4, rtol=1e-4)

    # Same batch with the auto tile (grid == 1 on single-TC chips).
    big_out2 = qnetwork_forward(big_state, w1p, b1p, w2p, b2p)
    jax.block_until_ready(big_out2)
    assert jnp.allclose(big_out2, big_ref, atol=1e-4, rtol=1e-4)

    print("KERNEL_OK")
</pallas_src>

<mosaic_0001>
module attributes {stable_mosaic.version = 11 : i64} {
  func.func @_qnet_kernel(%arg0: i32, %arg1: memref<8x4xf32, #tpu.memory_space<vmem>>, %arg2: memref<4x128xf32, #tpu.memory_space<vmem>>, %arg3: memref<1x128xf32, #tpu.memory_space<vmem>>, %arg4: memref<128x2xf32, #tpu.memory_space<vmem>>, %arg5: memref<1x2xf32, #tpu.memory_space<vmem>>, %arg6: memref<8x2xf32, #tpu.memory_space<vmem>>) attributes {dimension_semantics = [#tpu.dimension_semantics<parallel>], iteration_bounds = array<i64: 1>, scalar_prefetch = 0 : i64, scratch_operands = 0 : i64, tpu.core_type = #tpu.core_type<tc>, window_params = [{transform_indices = @transform_0, window_bounds = array<i64: 8, 4>}, {pipeline_mode = #tpu.pipeline_mode<synchronous>, transform_indices = @transform_1, window_bounds = array<i64: 4, 128>}, {pipeline_mode = #tpu.pipeline_mode<synchronous>, transform_indices = @transform_2, window_bounds = array<i64: 1, 128>}, {pipeline_mode = #tpu.pipeline_mode<synchronous>, transform_indices = @transform_3, window_bounds = array<i64: 128, 2>}, {pipeline_mode = #tpu.pipeline_mode<synchronous>, transform_indices = @transform_4, window_bounds = array<i64: 1, 2>}, {transform_indices = @transform_5, window_bounds = array<i64: 8, 2>}]} {
    %c0 = arith.constant 0 : index
    %c0_0 = arith.constant 0 : index
    %0 = vector.load %arg1[%c0, %c0_0] : memref<8x4xf32, #tpu.memory_space<vmem>>, vector<8x4xf32>
    %c0_1 = arith.constant 0 : index
    %c0_2 = arith.constant 0 : index
    %1 = vector.load %arg2[%c0_1, %c0_2] : memref<4x128xf32, #tpu.memory_space<vmem>>, vector<4x128xf32>
    %cst = arith.constant dense<0.000000e+00> : vector<8x128xf32>
    %2 = tpu.matmul %0, %1, %cst {dimension_numbers = #tpu.dot_dimension_numbers<[1], [0], [0], [1], [0, 0, 1, 1], [], []>} : vector<8x4xf32>, vector<4x128xf32>, vector<8x128xf32> -> vector<8x128xf32>
    %c0_3 = arith.constant 0 : index
    %c0_4 = arith.constant 0 : index
    %3 = vector.load %arg3[%c0_3, %c0_4] : memref<1x128xf32, #tpu.memory_space<vmem>>, vector<1x128xf32>
    %4 = vector.broadcast %3 : vector<1x128xf32> to vector<8x128xf32>
    %5 = arith.addf %2, %4 : vector<8x128xf32>
    %cst_5 = arith.constant 0.000000e+00 : f32
    %6 = vector.broadcast %cst_5 : f32 to vector<8x128xf32>
    %7 = arith.maximumf %5, %6 : vector<8x128xf32>
    %c0_6 = arith.constant 0 : index
    %c0_7 = arith.constant 0 : index
    %8 = vector.load %arg4[%c0_6, %c0_7] : memref<128x2xf32, #tpu.memory_space<vmem>>, vector<128x2xf32>
    %cst_8 = arith.constant dense<0.000000e+00> : vector<8x2xf32>
    %9 = tpu.matmul %7, %8, %cst_8 {dimension_numbers = #tpu.dot_dimension_numbers<[1], [0], [0], [1], [0, 0, 1, 1], [], []>} : vector<8x128xf32>, vector<128x2xf32>, vector<8x2xf32> -> vector<8x2xf32>
    %c0_9 = arith.constant 0 : index
    %c0_10 = arith.constant 0 : index
    %10 = vector.load %arg5[%c0_9, %c0_10] : memref<1x2xf32, #tpu.memory_space<vmem>>, vector<1x2xf32>
    %11 = vector.broadcast %10 : vector<1x2xf32> to vector<8x2xf32>
    %12 = arith.addf %9, %11 : vector<8x2xf32>
    %c0_11 = arith.constant 0 : index
    %c0_12 = arith.constant 0 : index
    %13 = vector.load %arg6[%c0_11, %c0_12] : memref<8x2xf32, #tpu.memory_space<vmem>>, vector<8x2xf32>
    tpu.vector_store %arg6[%c0_11, %c0_12], %12 {strides = array<i32>} : memref<8x2xf32, #tpu.memory_space<vmem>>, vector<8x2xf32>,
    return
  }
  func.func @transform_0(%arg0: i32) -> (i32, i32) {
    %c0_i32 = arith.constant 0 : i32
    %c0_i32_0 = arith.constant 0 : i32
    return %arg0, %c0_i32 : i32, i32
  }
  func.func @transform_1(%arg0: i32) -> (i32, i32) {
    %c0_i32 = arith.constant 0 : i32
    %c0_i32_0 = arith.constant 0 : i32
    %c0_i32_1 = arith.constant 0 : i32
    return %c0_i32, %c0_i32_0 : i32, i32
  }
  func.func @transform_2(%arg0: i32) -> (i32, i32) {
    %c0_i32 = arith.constant 0 : i32
    %c0_i32_0 = arith.constant 0 : i32
    %c0_i32_1 = arith.constant 0 : i32
    return %c0_i32, %c0_i32_0 : i32, i32
  }
  func.func @transform_3(%arg0: i32) -> (i32, i32) {
    %c0_i32 = arith.constant 0 : i32
    %c0_i32_0 = arith.constant 0 : i32
    %c0_i32_1 = arith.constant 0 : i32
    return %c0_i32, %c0_i32_0 : i32, i32
  }
  func.func @transform_4(%arg0: i32) -> (i32, i32) {
    %c0_i32 = arith.constant 0 : i32
    %c0_i32_0 = arith.constant 0 : i32
    %c0_i32_1 = arith.constant 0 : i32
    return %c0_i32, %c0_i32_0 : i32, i32
  }
  func.func @transform_5(%arg0: i32) -> (i32, i32) {
    %c0_i32 = arith.constant 0 : i32
    %c0_i32_0 = arith.constant 0 : i32
    return %arg0, %c0_i32 : i32, i32
  }
}

</mosaic_0001>

<bundles_post_ra>
// kernel: tpu_custom_call.1
= control target key start
LH: loop header
LB: loop body
LE: loop exit
PB: predicated region body
PF: predicated region fallthrough
CT: control target
= control target key end

     0   :  { %vm33_vm0 = vcmask 1043456   ;;  %vm29_vm1 = vcmask 31744   ;;  %v297_v0 = vmov 0.0   ;;  %vm298_vm2 = vmmov 0   ;;  %s393_s1 = inlined_call_operand.vmem [shape: f32[4,128], index: 1, kind: input, shape index: {}]   ;;  %s394_s0 = inlined_call_operand.vmem [shape: f32[8,4], index: 0, kind: input, shape index: {}]   ;;  %s395_s3 = inlined_call_operand.vmem [shape: f32[128,2], index: 3, kind: input, shape index: {}]   ;;  %s396_s2 = inlined_call_operand.vmem [shape: f32[1,128], index: 2, kind: input, shape index: {}]   ;;  %s397_s4 = inlined_call_operand.vmem [shape: f32[1,2], index: 4, kind: input, shape index: {}]   ;;  %s398_s5 = inlined_call_operand.vmem [shape: f32[8,2], index: 5, kind: output, shape index: {}]  }
   0x1   :  { %230 = vmatprep.subr.mxu0 %v297_v0  ;;  %v21_v1 = vld [vmem:[%s393_s1] sm:$0xf]  ;;  %232 = vmatprep.mubr.msk.f32.mxu0 %vm298_vm2, %v297_v0  ;;  %v299_v4 = vmov 0.0|0.0   ;;  %v109_v5 = vld [vmem:[%s395_s3 + $0x8] sm:$0xff]  ;;  %v110_v6 = vld [vmem:[%s395_s3 + $0x10] sm:$0xff]  ;;  %vm201_vm3 = vcmask 15360  }
   0x2   :  { %v20_v2 = vld [vmem:[%s394_s0] sm:$0xff]  ;;  %231 = vmatpush3.msk.msra.mxu0 %vm33_vm0, %v21_v1  ;;  %270 = vmatprep.subr.bf16.mxu1 %v299_v4  ;;  %v111_v7 = vld [vmem:[%s395_s3 + $0x18] sm:$0xff]  ;;  %v113_v11 = vld [vmem:[%s395_s3 + $0x28] sm:$0xff] }
   0x3   :  { %v108_v3 = vld [vmem:[%s395_s3] sm:$0xff]  ;;  %233 = vmatmul.mubr.msk.f32.vlgmr.msra.gmra.mrb[0].mxu0 %vm29_vm1, %v20_v2  ;;  %267 = vmatprep.mubr.msk.f32.mxu1 %vm298_vm2, %v297_v0  ;;  %v274_v9 = vpack.c.bf16 %v111_v7, %v110_v6  ;;  %v114_v13 = vld [vmem:[%s395_s3 + $0x30] sm:$0xff]  ;;  %v115_v14 = vld [vmem:[%s395_s3 + $0x38] sm:$0xff] }
   0x4   :  { %v271_v8 = vpack.c.bf16 %v109_v5, %v108_v3  ;;  %v112_v10 = vld [vmem:[%s395_s3 + $0x20] sm:$0xff]  ;;  %v280_v15 = vpack.c.bf16 %v115_v14, %v114_v13  ;;  %v117_v17 = vld [vmem:[%s395_s3 + $0x48] sm:$0xff]  ;;  %v118_v19 = vld [vmem:[%s395_s3 + $0x50] sm:$0xff] }
   0x5   :  { %v277_v12 = vpack.c.bf16 %v113_v11, %v112_v10  ;;  %v116_v16 = vld [vmem:[%s395_s3 + $0x40] sm:$0xff]  ;;  %v119_v20 = vld [vmem:[%s395_s3 + $0x58] sm:$0xff]  ;;  %v121_v23 = vld [vmem:[%s395_s3 + $0x68] sm:$0xff] }
   0x6   :  { %272 = vmatpush3.bf16.msra.mxu1 %v271_v8  ;;  %v283_v18 = vpack.c.bf16 %v117_v17, %v116_v16  ;;  %v286_v21 = vpack.c.bf16 %v119_v20, %v118_v19  ;;  %v120_v22 = vld [vmem:[%s395_s3 + $0x60] sm:$0xff]  ;;  %v122_v25 = vld [vmem:[%s395_s3 + $0x70] sm:$0xff]  ;;  %v123_v26 = vld [vmem:[%s395_s3 + $0x78] sm:$0xff] }
   0x7   :  { %273 = vmatprep.subr.bf16.mxu1 %v299_v4  ;;  %v289_v24 = vpack.c.bf16 %v121_v23, %v120_v22  ;;  %v292_v27 = vpack.c.bf16 %v123_v26, %v122_v25  ;;  %v207_v28 = vld [vmem:[%s396_s2] ss:$0 sm:$0xff] }
   0x8   :  { %v210_v33 = vld [vmem:[%s397_s4] ss:$0 sm:$0xff] }
   0xa   :  { %275 = vmatpush3.bf16.msra.mxu1 %v274_v9 }
   0xb   :  { %276 = vmatprep.subr.bf16.mxu1 %v299_v4 }
   0xe   :  { %278 = vmatpush3.bf16.msra.mxu1 %v277_v12 }
   0xf   :  { %279 = vmatprep.subr.bf16.mxu1 %v299_v4 }
  0x12   :  { %281 = vmatpush3.bf16.msra.mxu1 %v280_v15 }
  0x13   :  { %282 = vmatprep.subr.bf16.mxu1 %v299_v4 }
  0x16   :  { %284 = vmatpush3.bf16.msra.mxu1 %v283_v18 }
  0x17   :  { %285 = vmatprep.subr.bf16.mxu1 %v299_v4 }
  0x1a   :  { %287 = vmatpush3.bf16.msra.mxu1 %v286_v21 }
  0x1b   :  { %288 = vmatprep.subr.bf16.mxu1 %v299_v4 }
  0x1e   :  { %290 = vmatpush3.bf16.msra.mxu1 %v289_v24 }
  0x1f   :  { %291 = vmatprep.subr.bf16.mxu1 %v299_v4 }
  0x22   :  { %293 = vmatpush3.bf16.msra.mxu1 %v292_v27 }
  0xd6   :  { %v103_v29 = vpop.f32.mrb[0].mxu0 }
  0xd7   :  { %v104_v30 = vadd.f32 %v207_v28, %v103_v29  ;;  %v234_v31 = vpop.f32.mrb[1].mxu0 }
  0xd9   :  { %v107_v32 = vmax.f32 %v104_v30, 0.0 }
  0xdb   :  { %268 = vmatmul.mubr.f32.vlgmr.msra.gmra.mrb[0].mxu1 %v107_v32 }
 0x1ae   :  { %v197_v34 = vpop.f32.mrb[0].mxu1 }
 0x1af   :  { %v198_v35 = vadd.f32 %v210_v33, %v197_v34  ;;  %v269_v36 = vpop.f32.mrb[1].mxu1 }
 0x1b1   :  { %202 = vst.msk [vmem:[%s398_s5] sm:$0xff] %vm201_vm3, %v198_v35 }

</bundles_post_ra>
